<compile_context>
chip_gen: v7x
topology: tpu7x:2x2x1
jax: 0.10.0
libtpu: 0.0.40
codegen_flags: <defaults>
</compile_context>

<pallas_src>
import functools

import jax
import jax.numpy as jnp
from jax import lax
from jax.experimental import pallas as pl
from jax.experimental.pallas import tpu as pltpu

_MIB = 1024 * 1024


def _vmem_capacity_bytes() -> int:
    """Physical VMEM of the local chip; conservative (v7x-sized) fallback if unknown."""
    try:
        info = pltpu.get_tpu_info()
        for name in ("vmem_capacity_bytes", "vmem_size_bytes", "vmem_bytes"):
            cap = getattr(info, name, None)
            if cap:
                return int(cap)
    except Exception:
        pass
    return 64 * _MIB


def _plan_tiling(batch, feat_dim, hidden, feat_itemsize, w_itemsize,
                 max_tile_rows, single_buffer_weights):
    """Largest per-domain row tile whose working set fits the chip's VMEM budget."""
    cap = _vmem_capacity_bytes()
    budget = (cap * 3) // 4                        # headroom for compiler scratch
    w_bufs = 1 if single_buffer_weights else 2
    weight_bytes = w_bufs * (feat_dim * hidden * w_itemsize        # w1 (resident)
                             + 2 * 8 * max(hidden, 128) * 4)       # padded b1 / w2 rows
    # Per tile row: two feature streams x double buffer, plus the f32 hidden
    # activations (tile, H) of both streams.
    per_row = 2 * 2 * feat_dim * feat_itemsize + 2 * hidden * 4
    pack = max(8, 32 // feat_itemsize)             # sublane packing: 8 f32 / 16 bf16 / 32 i8
    avail = budget - weight_bytes - 4 * _MIB
    t = avail // per_row if avail > 0 else pack
    t = max(pack, min(int(t), int(max_tile_rows)))
    t = max(pack, (t // pack) * pack)
    tile_rows = batch if t >= batch else t         # a full-dim single tile is always legal
    working = per_row * tile_rows + weight_bytes
    vmem_limit = int(min(cap - 8 * _MIB, max(32 * _MIB, working + 8 * _MIB)))
    return tile_rows, vmem_limit


def _dann_kernel(f_s_ref, f_t_ref, w1_ref, b1_ref, w2_ref, b2_ref,
                 loss_part_ref, corr_part_ref, *, batch: int):
    """One grid step: one per-domain row tile of source AND target features.

    f_s_ref, f_t_ref : (tile, D)      per-domain feature tiles
    w1_ref           : (D, H)         first Linear weight (resident)
    b1_ref, w2_ref   : (1, H)         first Linear bias / second Linear weight row
    b2_ref           : (1,) SMEM      second Linear bias (scalar)
    loss_part_ref    : (1, 1, 128)    per-tile loss-sum partial (lane-dense block)
    corr_part_ref    : (1, 1, 128)    per-tile correct-count partial
    """
    i = pl.program_id(0)
    tile = f_s_ref.shape[0]

    w1 = w1_ref[...]                               # native dtype -> MXU at full rate
    b1 = b1_ref[...].astype(jnp.float32)           # (1, H)
    w2 = w2_ref[...].astype(jnp.float32)           # (1, H)
    b2 = b2_ref[0]                                 # scalar (SMEM)

    # Row-validity mask for the (possibly padded) last tile; lane-dense (1, tile).
    row = lax.broadcasted_iota(jnp.int32, (1, tile), 1) + i * tile
    valid = row < batch

    def logits(f_ref):
        # Linear(D, H) on the MXU (f32 accumulate) + ReLU.
        h = jnp.dot(f_ref[...], w1, preferred_element_type=jnp.float32) + b1
        h = jnp.maximum(h, 0.0)
        # Linear(H, 1): N=1 output -> VPU multiply + lane reduce; relayout the
        # logits into a lane-dense (1, tile) row so the epilogue does not sit
        # on skinny (tile, 1) vregs.
        d = jnp.sum(h * w2, axis=-1)               # (tile,)
        return d.reshape(1, tile) + b2             # (1, tile) f32

    d_s = logits(f_s_ref)                          # source rows, label y = 1
    d_t = logits(f_t_ref)                          # target rows, label y = 0

    def softplus(x):                               # log(1 + exp(x)), numerically stable
        return jnp.maximum(x, 0.0) + jnp.log1p(jnp.exp(-jnp.abs(x)))

    # BCE-with-logits: y=1 -> softplus(-d); y=0 -> softplus(d). Padded rows masked out.
    loss_sum = (jnp.sum(jnp.where(valid, softplus(-d_s), 0.0))
                + jnp.sum(jnp.where(valid, softplus(d_t), 0.0)))
    # binary_accuracy: pred = (sigmoid(d) >= 0.5)  <=>  d >= 0.
    correct = (jnp.sum(jnp.where(valid & (d_s >= 0.0), 1.0, 0.0))
               + jnp.sum(jnp.where(valid & (d_t < 0.0), 1.0, 0.0)))

    # Each grid step owns its own lane-dense output block -> "parallel" axis is safe.
    loss_part_ref[...] = jnp.full(loss_part_ref.shape, loss_sum, dtype=jnp.float32)
    corr_part_ref[...] = jnp.full(corr_part_ref.shape, correct, dtype=jnp.float32)


def domain_adversarial_loss(f_s, f_t, w1, b1, w2, b2, *, max_tile_rows: int = 2048):
    """Forward pass of DomainAdversarialLoss.

    Returns (dann_loss, domain_discriminator_accuracy) as f32 scalars.
      f_s, f_t : (B, D) source / target features
      w1 : (D, H), b1 : (H,) or (1, H)          -- first Linear
      w2 : (H, 1) or (H,), b2 : scalar-shaped   -- second Linear
    """
    assert f_s.shape == f_t.shape and f_s.ndim == 2
    B, D = f_s.shape
    H = w1.shape[1]

    # GRL forward is identity (the warm-start coeff only scales the backward).
    # TODO(synk): gradient-reversal backward (custom_vjp negating/scaling the
    # feature gradient by the warm-start coeff) is not implemented in this
    # forward-pass kernel.
    w2_row = jnp.reshape(w2, (1, H))
    b1_row = jnp.reshape(b1, (1, H))
    b2_s = jnp.asarray(b2, jnp.float32).reshape((1,))

    def run(single_buffer_weights: bool):
        tile_rows, vmem_limit = _plan_tiling(
            B, D, H, f_s.dtype.itemsize, w1.dtype.itemsize,
            max_tile_rows, single_buffer_weights)
        num_tiles = (B + tile_rows - 1) // tile_rows
        kernel = functools.partial(_dann_kernel, batch=B)

        def w_spec(shape):
            if single_buffer_weights:
                # Resident weights: constant index_map + single buffer (no
                # wasted second DMA buffer in VMEM).
                return pl.BlockSpec(shape, lambda i: (0,) * len(shape),
                                    pipeline_mode=pl.Buffered(1))
            return pl.BlockSpec(shape, lambda i: (0,) * len(shape))

        part_shape = jax.ShapeDtypeStruct((num_tiles, 1, 128), jnp.float32)
        part_spec = pl.BlockSpec((1, 1, 128), lambda i: (i, 0, 0))

        out = pl.pallas_call(
            kernel,
            out_shape=(part_shape, part_shape),
            grid=(num_tiles,),
            in_specs=[
                pl.BlockSpec((tile_rows, D), lambda i: (i, 0)),      # f_s tile
                pl.BlockSpec((tile_rows, D), lambda i: (i, 0)),      # f_t tile
                w_spec((D, H)),                                      # w1 (resident)
                w_spec((1, H)),                                      # b1
                w_spec((1, H)),                                      # w2 as a row
                pl.BlockSpec(memory_space=pltpu.MemorySpace.SMEM),   # b2 scalar
            ],
            out_specs=(part_spec, part_spec),
            compiler_params=pltpu.CompilerParams(
                # Independent per-tile partials: the row-tile axis can be
                # sharded across TensorCores (v7x megacore); no-op on v5e/v6e.
                dimension_semantics=("parallel",),
                vmem_limit_bytes=vmem_limit,
            ),
        )(f_s, f_t, w1, b1_row, w2_row, b2_s)
        jax.block_until_ready(out)
        return out

    try:
        loss_parts, corr_parts = run(True)
    except Exception:
        # pipeline_mode=pl.Buffered(1) unsupported on this jax/libtpu build:
        # fall back to default (double-buffered) resident weights.
        loss_parts, corr_parts = run(False)

    total = jnp.float32(2 * B)
    loss = jnp.sum(loss_parts[:, 0, 0]) / total
    acc = jnp.sum(corr_parts[:, 0, 0]) * (100.0 / total)
    return loss, acc


def _reference(f_s, f_t, w1, b1, w2, b2):
    """Pure-JAX reference mirroring the PyTorch semantics."""
    f = jnp.concatenate([f_s, f_t], axis=0).astype(jnp.float32)
    h = jnp.maximum(f @ w1.astype(jnp.float32) + jnp.reshape(b1, (1, -1)), 0.0)
    d = h @ jnp.reshape(w2, (-1, 1)).astype(jnp.float32) + jnp.asarray(b2, jnp.float32).reshape(())
    B = f_s.shape[0]
    y = jnp.concatenate([jnp.ones((B, 1)), jnp.zeros((B, 1))], axis=0)
    loss = jnp.mean(jnp.maximum(d, 0.0) - d * y + jnp.log1p(jnp.exp(-jnp.abs(d))))
    pred = (jax.nn.sigmoid(d) >= 0.5).astype(jnp.float32)
    acc = jnp.sum((pred == y).astype(jnp.float32)) * (100.0 / (2 * B))
    return loss, acc


def _make_inputs(key, B, D, H):
    k_fs, k_ft, k_w1, k_b1, k_w2, k_b2 = jax.random.split(key, 6)
    f_s = jax.random.normal(k_fs, (B, D), dtype=jnp.float32)
    f_t = jax.random.normal(k_ft, (B, D), dtype=jnp.float32) + 0.5
    w1 = 0.1 * jax.random.normal(k_w1, (D, H), dtype=jnp.float32)
    b1 = 0.1 * jax.random.normal(k_b1, (1, H), dtype=jnp.float32)
    w2 = 0.1 * jax.random.normal(k_w2, (H, 1), dtype=jnp.float32)
    b2 = 0.1 * jax.random.normal(k_b2, (1, 1), dtype=jnp.float32)
    return f_s, f_t, w1, b1, w2, b2


if __name__ == "__main__":
    key = jax.random.PRNGKey(0)
    k1, k2, k3 = jax.random.split(key, 3)

    # Test 1: small single-tile case.
    args = _make_inputs(k1, 8, 32, 32)
    loss, acc = domain_adversarial_loss(*args)
    jax.block_until_ready((loss, acc))
    ref_loss, ref_acc = _reference(*args)
    assert jnp.allclose(loss, ref_loss, rtol=1e-5, atol=1e-5), (loss, ref_loss)
    assert jnp.allclose(acc, ref_acc, rtol=1e-5, atol=1e-3), (acc, ref_acc)

    # Test 2: multi-tile grid with a masked partial last tile (B=36, tile=16 -> 3 tiles).
    args = _make_inputs(k2, 36, 128, 64)
    loss, acc = domain_adversarial_loss(*args, max_tile_rows=16)
    jax.block_until_ready((loss, acc))
    ref_loss, ref_acc = _reference(*args)
    assert jnp.allclose(loss, ref_loss, rtol=1e-5, atol=1e-5), (loss, ref_loss)
    assert jnp.allclose(acc, ref_acc, rtol=1e-4, atol=1e-3), (acc, ref_acc)

    # Test 3: batch that is not a multiple of 8, handled as a single full-dim tile.
    args = _make_inputs(k3, 12, 64, 32)
    loss, acc = domain_adversarial_loss(*args)
    jax.block_until_ready((loss, acc))
    ref_loss, ref_acc = _reference(*args)
    assert jnp.allclose(loss, ref_loss, rtol=1e-5, atol=1e-5), (loss, ref_loss)
    assert jnp.allclose(acc, ref_acc, rtol=1e-4, atol=1e-3), (acc, ref_acc)

    print("KERNEL_OK")
</pallas_src>

<mosaic_0001>
module attributes {stable_mosaic.version = 11 : i64} {
  func.func @_dann_kernel(%arg0: i32, %arg1: memref<8x32xf32, #tpu.memory_space<vmem>>, %arg2: memref<8x32xf32, #tpu.memory_space<vmem>>, %arg3: memref<32x32xf32, #tpu.memory_space<vmem>>, %arg4: memref<1x32xf32, #tpu.memory_space<vmem>>, %arg5: memref<1x32xf32, #tpu.memory_space<vmem>>, %arg6: memref<1xf32, #tpu.memory_space<smem>>, %arg7: memref<1x1x128xf32, #tpu.memory_space<vmem>>, %arg8: memref<1x1x128xf32, #tpu.memory_space<vmem>>) attributes {dimension_semantics = [#tpu.dimension_semantics<parallel>], iteration_bounds = array<i64: 1>, scalar_prefetch = 0 : i64, scratch_operands = 0 : i64, tpu.core_type = #tpu.core_type<tc>, window_params = [{transform_indices = @transform_0, window_bounds = array<i64: 8, 32>}, {transform_indices = @transform_1, window_bounds = array<i64: 8, 32>}, {pipeline_mode = #tpu.pipeline_mode<synchronous>, transform_indices = @transform_2, window_bounds = array<i64: 32, 32>}, {pipeline_mode = #tpu.pipeline_mode<synchronous>, transform_indices = @transform_3, window_bounds = array<i64: 1, 32>}, {pipeline_mode = #tpu.pipeline_mode<synchronous>, transform_indices = @transform_4, window_bounds = array<i64: 1, 32>}, {transform_indices = @transform_5, window_bounds = array<i64: 1>}, {transform_indices = @transform_6, window_bounds = array<i64: 1, 1, 128>}, {transform_indices = @transform_7, window_bounds = array<i64: 1, 1, 128>}]} {
    %c0 = arith.constant 0 : index
    %c0_0 = arith.constant 0 : index
    %0 = vector.load %arg3[%c0, %c0_0] : memref<32x32xf32, #tpu.memory_space<vmem>>, vector<32x32xf32>
    %c0_1 = arith.constant 0 : index
    %c0_2 = arith.constant 0 : index
    %1 = vector.load %arg4[%c0_1, %c0_2] : memref<1x32xf32, #tpu.memory_space<vmem>>, vector<1x32xf32>
    %c0_3 = arith.constant 0 : index
    %c0_4 = arith.constant 0 : index
    %2 = vector.load %arg5[%c0_3, %c0_4] : memref<1x32xf32, #tpu.memory_space<vmem>>, vector<1x32xf32>
    %c0_5 = arith.constant 0 : index
    %3 = memref.load %arg6[%c0_5] : memref<1xf32, #tpu.memory_space<smem>>
    %4 = tpu.iota {dimensions = array<i32: 1>} : vector<1x8xi32>
    %c8_i32 = arith.constant 8 : i32
    %5 = arith.muli %arg0, %c8_i32 : i32
    %6 = vector.broadcast %5 : i32 to vector<1x8xi32>
    %7 = arith.addi %4, %6 : vector<1x8xi32>
    %c8_i32_6 = arith.constant 8 : i32
    %8 = vector.broadcast %c8_i32_6 : i32 to vector<1x8xi32>
    %9 = arith.cmpi slt, %7, %8 : vector<1x8xi32>
    %c0_7 = arith.constant 0 : index
    %c0_8 = arith.constant 0 : index
    %10 = vector.load %arg1[%c0_7, %c0_8] : memref<8x32xf32, #tpu.memory_space<vmem>>, vector<8x32xf32>
    %cst = arith.constant dense<0.000000e+00> : vector<8x32xf32>
    %11 = tpu.matmul %10, %0, %cst {dimension_numbers = #tpu.dot_dimension_numbers<[1], [0], [0], [1], [0, 0, 1, 1], [], []>} : vector<8x32xf32>, vector<32x32xf32>, vector<8x32xf32> -> vector<8x32xf32>
    %12 = vector.broadcast %1 : vector<1x32xf32> to vector<8x32xf32>
    %13 = arith.addf %11, %12 : vector<8x32xf32>
    %cst_9 = arith.constant 0.000000e+00 : f32
    %14 = vector.broadcast %cst_9 : f32 to vector<8x32xf32>
    %15 = arith.maximumf %13, %14 : vector<8x32xf32>
    %16 = vector.broadcast %2 : vector<1x32xf32> to vector<8x32xf32>
    %17 = arith.mulf %15, %16 : vector<8x32xf32>
    %cst_10 = arith.constant dense<0.000000e+00> : vector<8xf32>
    %18 = vector.multi_reduction <add>, %17, %cst_10 [1] : vector<8x32xf32> to vector<8xf32>
    %19 = vector.shape_cast %18 : vector<8xf32> to vector<1x8xf32>
    %20 = vector.broadcast %3 : f32 to vector<1x8xf32>
    %21 = arith.addf %19, %20 : vector<1x8xf32>
    %c0_11 = arith.constant 0 : index
    %c0_12 = arith.constant 0 : index
    %22 = vector.load %arg2[%c0_11, %c0_12] : memref<8x32xf32, #tpu.memory_space<vmem>>, vector<8x32xf32>
    %cst_13 = arith.constant dense<0.000000e+00> : vector<8x32xf32>
    %23 = tpu.matmul %22, %0, %cst_13 {dimension_numbers = #tpu.dot_dimension_numbers<[1], [0], [0], [1], [0, 0, 1, 1], [], []>} : vector<8x32xf32>, vector<32x32xf32>, vector<8x32xf32> -> vector<8x32xf32>
    %24 = vector.broadcast %1 : vector<1x32xf32> to vector<8x32xf32>
    %25 = arith.addf %23, %24 : vector<8x32xf32>
    %cst_14 = arith.constant 0.000000e+00 : f32
    %26 = vector.broadcast %cst_14 : f32 to vector<8x32xf32>
    %27 = arith.maximumf %25, %26 : vector<8x32xf32>
    %28 = vector.broadcast %2 : vector<1x32xf32> to vector<8x32xf32>
    %29 = arith.mulf %27, %28 : vector<8x32xf32>
    %cst_15 = arith.constant dense<0.000000e+00> : vector<8xf32>
    %30 = vector.multi_reduction <add>, %29, %cst_15 [1] : vector<8x32xf32> to vector<8xf32>
    %31 = vector.shape_cast %30 : vector<8xf32> to vector<1x8xf32>
    %32 = vector.broadcast %3 : f32 to vector<1x8xf32>
    %33 = arith.addf %31, %32 : vector<1x8xf32>
    %cst_16 = arith.constant 0.000000e+00 : f32
    %34 = vector.broadcast %cst_16 : f32 to vector<1x8xf32>
    %35 = arith.subf %34, %21 : vector<1x8xf32>
    %cst_17 = arith.constant 0.000000e+00 : f32
    %36 = vector.broadcast %cst_17 : f32 to vector<1x8xf32>
    %37 = arith.maximumf %35, %36 : vector<1x8xf32>
    %38 = math.absf %35 : vector<1x8xf32>
    %cst_18 = arith.constant 0.000000e+00 : f32
    %39 = vector.broadcast %cst_18 : f32 to vector<1x8xf32>
    %40 = arith.subf %39, %38 : vector<1x8xf32>
    %41 = math.exp %40 : vector<1x8xf32>
    %42 = math.log1p %41 : vector<1x8xf32>
    %43 = arith.addf %37, %42 : vector<1x8xf32>
    %cst_19 = arith.constant 0.000000e+00 : f32
    %44 = vector.broadcast %cst_19 : f32 to vector<1x8xf32>
    %45 = arith.select %9, %43, %44 : vector<1x8xi1>, vector<1x8xf32>
    %46 = vector.shape_cast %45 : vector<1x8xf32> to vector<1x1x8xf32>
    %cst_20 = arith.constant dense<0.000000e+00> : vector<1xf32>
    %47 = vector.multi_reduction <add>, %46, %cst_20 [1, 2] : vector<1x1x8xf32> to vector<1xf32>
    %48 = vector.shape_cast %47 : vector<1xf32> to vector<1x1x1xf32>
    %49 = vector.extract %48[0, 0, 0] : f32 from vector<1x1x1xf32>
    %cst_21 = arith.constant 0.000000e+00 : f32
    %50 = vector.broadcast %cst_21 : f32 to vector<1x8xf32>
    %51 = arith.maximumf %33, %50 : vector<1x8xf32>
    %52 = math.absf %33 : vector<1x8xf32>
    %cst_22 = arith.constant 0.000000e+00 : f32
    %53 = vector.broadcast %cst_22 : f32 to vector<1x8xf32>
    %54 = arith.subf %53, %52 : vector<1x8xf32>
    %55 = math.exp %54 : vector<1x8xf32>
    %56 = math.log1p %55 : vector<1x8xf32>
    %57 = arith.addf %51, %56 : vector<1x8xf32>
    %cst_23 = arith.constant 0.000000e+00 : f32
    %58 = vector.broadcast %cst_23 : f32 to vector<1x8xf32>
    %59 = arith.select %9, %57, %58 : vector<1x8xi1>, vector<1x8xf32>
    %60 = vector.shape_cast %59 : vector<1x8xf32> to vector<1x1x8xf32>
    %cst_24 = arith.constant dense<0.000000e+00> : vector<1xf32>
    %61 = vector.multi_reduction <add>, %60, %cst_24 [1, 2] : vector<1x1x8xf32> to vector<1xf32>
    %62 = vector.shape_cast %61 : vector<1xf32> to vector<1x1x1xf32>
    %63 = vector.extract %62[0, 0, 0] : f32 from vector<1x1x1xf32>
    %64 = arith.addf %49, %63 : f32
    %cst_25 = arith.constant 0.000000e+00 : f32
    %65 = vector.broadcast %cst_25 : f32 to vector<1x8xf32>
    %66 = arith.cmpf oge, %21, %65 : vector<1x8xf32>
    %67 = arith.andi %9, %66 : vector<1x8xi1>
    %cst_26 = arith.constant 1.000000e+00 : f32
    %cst_27 = arith.constant 0.000000e+00 : f32
    %68 = vector.broadcast %cst_26 : f32 to vector<1x8xf32>
    %69 = vector.broadcast %cst_27 : f32 to vector<1x8xf32>
    %70 = arith.select %67, %68, %69 : vector<1x8xi1>, vector<1x8xf32>
    %71 = vector.shape_cast %70 : vector<1x8xf32> to vector<1x1x8xf32>
    %cst_28 = arith.constant dense<0.000000e+00> : vector<1xf32>
    %72 = vector.multi_reduction <add>, %71, %cst_28 [1, 2] : vector<1x1x8xf32> to vector<1xf32>
    %73 = vector.shape_cast %72 : vector<1xf32> to vector<1x1x1xf32>
    %74 = vector.extract %73[0, 0, 0] : f32 from vector<1x1x1xf32>
    %cst_29 = arith.constant 0.000000e+00 : f32
    %75 = vector.broadcast %cst_29 : f32 to vector<1x8xf32>
    %76 = arith.cmpf olt, %33, %75 : vector<1x8xf32>
    %77 = arith.andi %9, %76 : vector<1x8xi1>
    %cst_30 = arith.constant 1.000000e+00 : f32
    %cst_31 = arith.constant 0.000000e+00 : f32
    %78 = vector.broadcast %cst_30 : f32 to vector<1x8xf32>
    %79 = vector.broadcast %cst_31 : f32 to vector<1x8xf32>
    %80 = arith.select %77, %78, %79 : vector<1x8xi1>, vector<1x8xf32>
    %81 = vector.shape_cast %80 : vector<1x8xf32> to vector<1x1x8xf32>
    %cst_32 = arith.constant dense<0.000000e+00> : vector<1xf32>
    %82 = vector.multi_reduction <add>, %81, %cst_32 [1, 2] : vector<1x1x8xf32> to vector<1xf32>
    %83 = vector.shape_cast %82 : vector<1xf32> to vector<1x1x1xf32>
    %84 = vector.extract %83[0, 0, 0] : f32 from vector<1x1x1xf32>
    %85 = arith.addf %74, %84 : f32
    %86 = vector.broadcast %64 : f32 to vector<1x1x128xf32>
    %c0_33 = arith.constant 0 : index
    %c0_34 = arith.constant 0 : index
    %c0_35 = arith.constant 0 : index
    %87 = vector.load %arg7[%c0_33, %c0_34, %c0_35] : memref<1x1x128xf32, #tpu.memory_space<vmem>>, vector<1x1x128xf32>
    tpu.vector_store %arg7[%c0_33, %c0_34, %c0_35], %86 {strides = array<i32>} : memref<1x1x128xf32, #tpu.memory_space<vmem>>, vector<1x1x128xf32>,
    %88 = vector.broadcast %85 : f32 to vector<1x1x128xf32>
    %c0_36 = arith.constant 0 : index
    %c0_37 = arith.constant 0 : index
    %c0_38 = arith.constant 0 : index
    %89 = vector.load %arg8[%c0_36, %c0_37, %c0_38] : memref<1x1x128xf32, #tpu.memory_space<vmem>>, vector<1x1x128xf32>
    tpu.vector_store %arg8[%c0_36, %c0_37, %c0_38], %88 {strides = array<i32>} : memref<1x1x128xf32, #tpu.memory_space<vmem>>, vector<1x1x128xf32>,
    return
  }
  func.func @transform_0(%arg0: i32) -> (i32, i32) {
    %c0_i32 = arith.constant 0 : i32
    %c0_i32_0 = arith.constant 0 : i32
    return %arg0, %c0_i32 : i32, i32
  }
  func.func @transform_1(%arg0: i32) -> (i32, i32) {
    %c0_i32 = arith.constant 0 : i32
    %c0_i32_0 = arith.constant 0 : i32
    return %arg0, %c0_i32 : i32, i32
  }
  func.func @transform_2(%arg0: i32) -> (i32, i32) {
    %c0_i32 = arith.constant 0 : i32
    %c0_i32_0 = arith.constant 0 : i32
    %c0_i32_1 = arith.constant 0 : i32
    return %c0_i32, %c0_i32_0 : i32, i32
  }
  func.func @transform_3(%arg0: i32) -> (i32, i32) {
    %c0_i32 = arith.constant 0 : i32
    %c0_i32_0 = arith.constant 0 : i32
    %c0_i32_1 = arith.constant 0 : i32
    return %c0_i32, %c0_i32_0 : i32, i32
  }
  func.func @transform_4(%arg0: i32) -> (i32, i32) {
    %c0_i32 = arith.constant 0 : i32
    %c0_i32_0 = arith.constant 0 : i32
    %c0_i32_1 = arith.constant 0 : i32
    return %c0_i32, %c0_i32_0 : i32, i32
  }
  func.func @transform_5(%arg0: i32) -> i32 {
    %c0_i32 = arith.constant 0 : i32
    %c0_i32_0 = arith.constant 0 : i32
    return %c0_i32 : i32
  }
  func.func @transform_6(%arg0: i32) -> (i32, i32, i32) {
    %c0_i32 = arith.constant 0 : i32
    %c0_i32_0 = arith.constant 0 : i32
    %c0_i32_1 = arith.constant 0 : i32
    return %arg0, %c0_i32, %c0_i32_0 : i32, i32, i32
  }
  func.func @transform_7(%arg0: i32) -> (i32, i32, i32) {
    %c0_i32 = arith.constant 0 : i32
    %c0_i32_0 = arith.constant 0 : i32
    %c0_i32_1 = arith.constant 0 : i32
    return %arg0, %c0_i32, %c0_i32_0 : i32, i32, i32
  }
}

module attributes {stable_mosaic.version = 11 : i64} {
  func.func @_dann_kernel(%arg0: i32, %arg1: memref<8x32xf32, #tpu.memory_space<vmem>>, %arg2: memref<8x32xf32, #tpu.memory_space<vmem>>, %arg3: memref<32x32xf32, #tpu.memory_space<vmem>>, %arg4: memref<1x32xf32, #tpu.memory_space<vmem>>, %arg5: memref<1x32xf32, #tpu.memory_space<vmem>>, %arg6: memref<1xf32, #tpu.memory_space<smem>>, %arg7: memref<1x1x128xf32, #tpu.memory_space<vmem>>, %arg8: memref<1x1x128xf32, #tpu.memory_space<vmem>>) attributes {dimension_semantics = [#tpu.dimension_semantics<parallel>], iteration_bounds = array<i64: 1>, scalar_prefetch = 0 : i64, scratch_operands = 0 : i64, tpu.core_type = #tpu.core_type<tc>, window_params = [{transform_indices = @transform_0, window_bounds = array<i64: 8, 32>}, {transform_indices = @transform_1, window_bounds = array<i64: 8, 32>}, {pipeline_mode = #tpu.pipeline_mode<synchronous>, transform_indices = @transform_2, window_bounds = array<i64: 32, 32>}, {pipeline_mode = #tpu.pipeline_mode<synchronous>, transform_indices = @transform_3, window_bounds = array<i64: 1, 32>}, {pipeline_mode = #tpu.pipeline_mode<synchronous>, transform_indices = @transform_4, window_bounds = array<i64: 1, 32>}, {transform_indices = @transform_5, window_bounds = array<i64: 1>}, {transform_indices = @transform_6, window_bounds = array<i64: 1, 1, 128>}, {transform_indices = @transform_7, window_bounds = array<i64: 1, 1, 128>}]} {
    %c0 = arith.constant 0 : index
    %c0_0 = arith.constant 0 : index
    %0 = vector.load %arg3[%c0, %c0_0] : memref<32x32xf32, #tpu.memory_space<vmem>>, vector<32x32xf32>
    %c0_1 = arith.constant 0 : index
    %c0_2 = arith.constant 0 : index
    %1 = vector.load %arg4[%c0_1, %c0_2] : memref<1x32xf32, #tpu.memory_space<vmem>>, vector<1x32xf32>
    %c0_3 = arith.constant 0 : index
    %c0_4 = arith.constant 0 : index
    %2 = vector.load %arg5[%c0_3, %c0_4] : memref<1x32xf32, #tpu.memory_space<vmem>>, vector<1x32xf32>
    %c0_5 = arith.constant 0 : index
    %3 = memref.load %arg6[%c0_5] : memref<1xf32, #tpu.memory_space<smem>>
    %4 = tpu.iota {dimensions = array<i32: 1>} : vector<1x8xi32>
    %c8_i32 = arith.constant 8 : i32
    %5 = arith.muli %arg0, %c8_i32 : i32
    %6 = vector.broadcast %5 : i32 to vector<1x8xi32>
    %7 = arith.addi %4, %6 : vector<1x8xi32>
    %c8_i32_6 = arith.constant 8 : i32
    %8 = vector.broadcast %c8_i32_6 : i32 to vector<1x8xi32>
    %9 = arith.cmpi slt, %7, %8 : vector<1x8xi32>
    %c0_7 = arith.constant 0 : index
    %c0_8 = arith.constant 0 : index
    %10 = vector.load %arg1[%c0_7, %c0_8] : memref<8x32xf32, #tpu.memory_space<vmem>>, vector<8x32xf32>
    %cst = arith.constant dense<0.000000e+00> : vector<8x32xf32>
    %11 = tpu.matmul %10, %0, %cst {dimension_numbers = #tpu.dot_dimension_numbers<[1], [0], [0], [1], [0, 0, 1, 1], [], []>} : vector<8x32xf32>, vector<32x32xf32>, vector<8x32xf32> -> vector<8x32xf32>
    %12 = vector.broadcast %1 : vector<1x32xf32> to vector<8x32xf32>
    %13 = arith.addf %11, %12 : vector<8x32xf32>
    %cst_9 = arith.constant 0.000000e+00 : f32
    %14 = vector.broadcast %cst_9 : f32 to vector<8x32xf32>
    %15 = arith.maximumf %13, %14 : vector<8x32xf32>
    %16 = vector.broadcast %2 : vector<1x32xf32> to vector<8x32xf32>
    %17 = arith.mulf %15, %16 : vector<8x32xf32>
    %cst_10 = arith.constant dense<0.000000e+00> : vector<8xf32>
    %18 = vector.multi_reduction <add>, %17, %cst_10 [1] : vector<8x32xf32> to vector<8xf32>
    %19 = vector.shape_cast %18 : vector<8xf32> to vector<1x8xf32>
    %20 = vector.broadcast %3 : f32 to vector<1x8xf32>
    %21 = arith.addf %19, %20 : vector<1x8xf32>
    %c0_11 = arith.constant 0 : index
    %c0_12 = arith.constant 0 : index
    %22 = vector.load %arg2[%c0_11, %c0_12] : memref<8x32xf32, #tpu.memory_space<vmem>>, vector<8x32xf32>
    %cst_13 = arith.constant dense<0.000000e+00> : vector<8x32xf32>
    %23 = tpu.matmul %22, %0, %cst_13 {dimension_numbers = #tpu.dot_dimension_numbers<[1], [0], [0], [1], [0, 0, 1, 1], [], []>} : vector<8x32xf32>, vector<32x32xf32>, vector<8x32xf32> -> vector<8x32xf32>
    %24 = vector.broadcast %1 : vector<1x32xf32> to vector<8x32xf32>
    %25 = arith.addf %23, %24 : vector<8x32xf32>
    %cst_14 = arith.constant 0.000000e+00 : f32
    %26 = vector.broadcast %cst_14 : f32 to vector<8x32xf32>
    %27 = arith.maximumf %25, %26 : vector<8x32xf32>
    %28 = vector.broadcast %2 : vector<1x32xf32> to vector<8x32xf32>
    %29 = arith.mulf %27, %28 : vector<8x32xf32>
    %cst_15 = arith.constant dense<0.000000e+00> : vector<8xf32>
    %30 = vector.multi_reduction <add>, %29, %cst_15 [1] : vector<8x32xf32> to vector<8xf32>
    %31 = vector.shape_cast %30 : vector<8xf32> to vector<1x8xf32>
    %32 = vector.broadcast %3 : f32 to vector<1x8xf32>
    %33 = arith.addf %31, %32 : vector<1x8xf32>
    %cst_16 = arith.constant 0.000000e+00 : f32
    %34 = vector.broadcast %cst_16 : f32 to vector<1x8xf32>
    %35 = arith.subf %34, %21 : vector<1x8xf32>
    %cst_17 = arith.constant 0.000000e+00 : f32
    %36 = vector.broadcast %cst_17 : f32 to vector<1x8xf32>
    %37 = arith.maximumf %35, %36 : vector<1x8xf32>
    %38 = math.absf %35 : vector<1x8xf32>
    %cst_18 = arith.constant 0.000000e+00 : f32
    %39 = vector.broadcast %cst_18 : f32 to vector<1x8xf32>
    %40 = arith.subf %39, %38 : vector<1x8xf32>
    %41 = math.exp %40 : vector<1x8xf32>
    %42 = math.log1p %41 : vector<1x8xf32>
    %43 = arith.addf %37, %42 : vector<1x8xf32>
    %cst_19 = arith.constant 0.000000e+00 : f32
    %44 = vector.broadcast %cst_19 : f32 to vector<1x8xf32>
    %45 = arith.select %9, %43, %44 : vector<1x8xi1>, vector<1x8xf32>
    %46 = vector.shape_cast %45 : vector<1x8xf32> to vector<1x1x8xf32>
    %cst_20 = arith.constant dense<0.000000e+00> : vector<1xf32>
    %47 = vector.multi_reduction <add>, %46, %cst_20 [1, 2] : vector<1x1x8xf32> to vector<1xf32>
    %48 = vector.shape_cast %47 : vector<1xf32> to vector<1x1x1xf32>
    %49 = vector.extract %48[0, 0, 0] : f32 from vector<1x1x1xf32>
    %cst_21 = arith.constant 0.000000e+00 : f32
    %50 = vector.broadcast %cst_21 : f32 to vector<1x8xf32>
    %51 = arith.maximumf %33, %50 : vector<1x8xf32>
    %52 = math.absf %33 : vector<1x8xf32>
    %cst_22 = arith.constant 0.000000e+00 : f32
    %53 = vector.broadcast %cst_22 : f32 to vector<1x8xf32>
    %54 = arith.subf %53, %52 : vector<1x8xf32>
    %55 = math.exp %54 : vector<1x8xf32>
    %56 = math.log1p %55 : vector<1x8xf32>
    %57 = arith.addf %51, %56 : vector<1x8xf32>
    %cst_23 = arith.constant 0.000000e+00 : f32
    %58 = vector.broadcast %cst_23 : f32 to vector<1x8xf32>
    %59 = arith.select %9, %57, %58 : vector<1x8xi1>, vector<1x8xf32>
    %60 = vector.shape_cast %59 : vector<1x8xf32> to vector<1x1x8xf32>
    %cst_24 = arith.constant dense<0.000000e+00> : vector<1xf32>
    %61 = vector.multi_reduction <add>, %60, %cst_24 [1, 2] : vector<1x1x8xf32> to vector<1xf32>
    %62 = vector.shape_cast %61 : vector<1xf32> to vector<1x1x1xf32>
    %63 = vector.extract %62[0, 0, 0] : f32 from vector<1x1x1xf32>
    %64 = arith.addf %49, %63 : f32
    %cst_25 = arith.constant 0.000000e+00 : f32
    %65 = vector.broadcast %cst_25 : f32 to vector<1x8xf32>
    %66 = arith.cmpf oge, %21, %65 : vector<1x8xf32>
    %67 = arith.andi %9, %66 : vector<1x8xi1>
    %cst_26 = arith.constant 1.000000e+00 : f32
    %cst_27 = arith.constant 0.000000e+00 : f32
    %68 = vector.broadcast %cst_26 : f32 to vector<1x8xf32>
    %69 = vector.broadcast %cst_27 : f32 to vector<1x8xf32>
    %70 = arith.select %67, %68, %69 : vector<1x8xi1>, vector<1x8xf32>
    %71 = vector.shape_cast %70 : vector<1x8xf32> to vector<1x1x8xf32>
    %cst_28 = arith.constant dense<0.000000e+00> : vector<1xf32>
    %72 = vector.multi_reduction <add>, %71, %cst_28 [1, 2] : vector<1x1x8xf32> to vector<1xf32>
    %73 = vector.shape_cast %72 : vector<1xf32> to vector<1x1x1xf32>
    %74 = vector.extract %73[0, 0, 0] : f32 from vector<1x1x1xf32>
    %cst_29 = arith.constant 0.000000e+00 : f32
    %75 = vector.broadcast %cst_29 : f32 to vector<1x8xf32>
    %76 = arith.cmpf olt, %33, %75 : vector<1x8xf32>
    %77 = arith.andi %9, %76 : vector<1x8xi1>
    %cst_30 = arith.constant 1.000000e+00 : f32
    %cst_31 = arith.constant 0.000000e+00 : f32
    %78 = vector.broadcast %cst_30 : f32 to vector<1x8xf32>
    %79 = vector.broadcast %cst_31 : f32 to vector<1x8xf32>
    %80 = arith.select %77, %78, %79 : vector<1x8xi1>, vector<1x8xf32>
    %81 = vector.shape_cast %80 : vector<1x8xf32> to vector<1x1x8xf32>
    %cst_32 = arith.constant dense<0.000000e+00> : vector<1xf32>
    %82 = vector.multi_reduction <add>, %81, %cst_32 [1, 2] : vector<1x1x8xf32> to vector<1xf32>
    %83 = vector.shape_cast %82 : vector<1xf32> to vector<1x1x1xf32>
    %84 = vector.extract %83[0, 0, 0] : f32 from vector<1x1x1xf32>
    %85 = arith.addf %74, %84 : f32
    %86 = vector.broadcast %64 : f32 to vector<1x1x128xf32>
    %c0_33 = arith.constant 0 : index
    %c0_34 = arith.constant 0 : index
    %c0_35 = arith.constant 0 : index
    %87 = vector.load %arg7[%c0_33, %c0_34, %c0_35] : memref<1x1x128xf32, #tpu.memory_space<vmem>>, vector<1x1x128xf32>
    tpu.vector_store %arg7[%c0_33, %c0_34, %c0_35], %86 {strides = array<i32>} : memref<1x1x128xf32, #tpu.memory_space<vmem>>, vector<1x1x128xf32>,
    %88 = vector.broadcast %85 : f32 to vector<1x1x128xf32>
    %c0_36 = arith.constant 0 : index
    %c0_37 = arith.constant 0 : index
    %c0_38 = arith.constant 0 : index
    %89 = vector.load %arg8[%c0_36, %c0_37, %c0_38] : memref<1x1x128xf32, #tpu.memory_space<vmem>>, vector<1x1x128xf32>
    tpu.vector_store %arg8[%c0_36, %c0_37, %c0_38], %88 {strides = array<i32>} : memref<1x1x128xf32, #tpu.memory_space<vmem>>, vector<1x1x128xf32>,
    return
  }
  func.func @transform_0(%arg0: i32) -> (i32, i32) {
    %c0_i32 = arith.constant 0 : i32
    %c0_i32_0 = arith.constant 0 : i32
    return %arg0, %c0_i32 : i32, i32
  }
  func.func @transform_1(%arg0: i32) -> (i32, i32) {
    %c0_i32 = arith.constant 0 : i32
    %c0_i32_0 = arith.constant 0 : i32
    return %arg0, %c0_i32 : i32, i32
  }
  func.func @transform_2(%arg0: i32) -> (i32, i32) {
    %c0_i32 = arith.constant 0 : i32
    %c0_i32_0 = arith.constant 0 : i32
    %c0_i32_1 = arith.constant 0 : i32
    return %c0_i32, %c0_i32_0 : i32, i32
  }
  func.func @transform_3(%arg0: i32) -> (i32, i32) {
    %c0_i32 = arith.constant 0 : i32
    %c0_i32_0 = arith.constant 0 : i32
    %c0_i32_1 = arith.constant 0 : i32
    return %c0_i32, %c0_i32_0 : i32, i32
  }
  func.func @transform_4(%arg0: i32) -> (i32, i32) {
    %c0_i32 = arith.constant 0 : i32
    %c0_i32_0 = arith.constant 0 : i32
    %c0_i32_1 = arith.constant 0 : i32
    return %c0_i32, %c0_i32_0 : i32, i32
  }
  func.func @transform_5(%arg0: i32) -> i32 {
    %c0_i32 = arith.constant 0 : i32
    %c0_i32_0 = arith.constant 0 : i32
    return %c0_i32 : i32
  }
  func.func @transform_6(%arg0: i32) -> (i32, i32, i32) {
    %c0_i32 = arith.constant 0 : i32
    %c0_i32_0 = arith.constant 0 : i32
    %c0_i32_1 = arith.constant 0 : i32
    return %arg0, %c0_i32, %c0_i32_0 : i32, i32, i32
  }
  func.func @transform_7(%arg0: i32) -> (i32, i32, i32) {
    %c0_i32 = arith.constant 0 : i32
    %c0_i32_0 = arith.constant 0 : i32
    %c0_i32_1 = arith.constant 0 : i32
    return %arg0, %c0_i32, %c0_i32_0 : i32, i32, i32
  }
}

</mosaic_0001>

<bundles_post_ra>
// kernel: tpu_custom_call.1
= control target key start
LH: loop header
LB: loop body
LE: loop exit
PB: predicated region body
PF: predicated region fallthrough
CT: control target
= control target key end

     0   :  { %14 = vsyncpa [#allocation4], 0  ;;  %s737_s0 = inlined_call_operand.hbm [shape: f32[8,32], index: 0, kind: input, shape index: {}]   ;;  %s738_s1 = inlined_call_operand.hbm [shape: f32[8,32], index: 1, kind: input, shape index: {}]   ;;  %s739_s2 = inlined_call_operand.hbm [shape: f32[32,32], index: 2, kind: input, shape index: {}]   ;;  %s740_s3 = inlined_call_operand.vmem [shape: f32[1,32], index: 3, kind: input, shape index: {}]   ;;  %s741_s4 = inlined_call_operand.vmem [shape: f32[1,32], index: 4, kind: input, shape index: {}]   ;;  %s742_s5 = inlined_call_operand.<no memory space> [shape: f32[1], index: 5, kind: input, shape index: {}]   ;;  %s743_s6 = inlined_call_operand.hbm [shape: f32[1,1,128], index: 6, kind: output, shape index: {0}]   ;;  %s744_s7 = inlined_call_operand.hbm [shape: f32[1,1,128], index: 7, kind: output, shape index: {1}]  }
   0x1   :  { %15 = vsyncpa [#allocation7], 0 }
   0x2   :  { %16 = vsyncpa [#allocation5], 0 }
   0x3   :  { %17 = vsyncpa [#allocation11], 0  ;;  %s585_s24 = smov [#allocation6]   ;;  %s586_s26 = smov [#allocation3]  }
   0x4   :  { %s34_s25 = sshll.u32 %s585_s24, 4  ;;  %s24_s27 = sshll.u32 %s586_s26, 4  ;;  %s35_s25 = int_to_ptr.vmem [resolvable:$true] %s34_s25  ;;  %s25_s27 = int_to_ptr.vmem [resolvable:$true] %s24_s27 }
   0x5   :  { %s467_s30 = scalar_lea.hbm %s738_s1, 128 }
   0x6   :  { %p468_p0 = scmp.ne.s32.totalorder %s738_s1, %s467_s30  ;;  %p471_p1 = scmp.lt.u32.totalorder %s467_s30, %s738_s1 }
   0x8   :  { %p473_p2 = pnand %p471_p1, %p468_p0 }
   0xa   :  { %476 = shalt.err (!%p473_p2)
}
   0xb   :  { %s477_s12 = scalar_lea.vmem %s35_s25, 128  ;;  %p482_p4 = scmp.lt.s32.totalorder %s35_s25, %s35_s25 }
   0xc   :  { %p478_p3 = scmp.ne.s32.totalorder %s35_s25, %s477_s12  ;;  %p483_p5 = scmp.lt.s32.totalorder %s477_s12, %s477_s12 }
   0xe   :  { %p484_p6 = por %p483_p5, %p482_p4 }
  0x10   :  { %p485_p7 = pnand %p484_p6, %p478_p3 }
  0x12   :  { %488 = shalt.err (!%p485_p7)
}
  0x13   :  { %37 = dma.hbm_to_vmem [thread:$0]  %s738_s1, 128, %s35_s25, [#allocation7]  }
  0x14   :  { %s489_s17 = scalar_lea.hbm %s737_s0, 128 }
  0x15   :  { %p490_p8 = scmp.ne.s32.totalorder %s737_s0, %s489_s17  ;;  %p493_p9 = scmp.lt.u32.totalorder %s489_s17, %s737_s0 }
  0x17   :  { %p495_p10 = pnand %p493_p9, %p490_p8 }
  0x19   :  { %498 = shalt.err (!%p495_p10)
}
  0x1a   :  { %s499_s22 = scalar_lea.vmem %s25_s27, 128  ;;  %p504_p12 = scmp.lt.s32.totalorder %s25_s27, %s25_s27 }
  0x1b   :  { %p500_p11 = scmp.ne.s32.totalorder %s25_s27, %s499_s22  ;;  %p505_p13 = scmp.lt.s32.totalorder %s499_s22, %s499_s22 }
  0x1d   :  { %p506_p0 = por %p505_p13, %p504_p12 }
  0x1f   :  { %p507_p1 = pnand %p506_p0, %p500_p11 }
  0x21   :  { %510 = shalt.err (!%p507_p1)
}
  0x22   :  { %27 = dma.hbm_to_vmem [thread:$0]  %s737_s0, 128, %s25_s27, [#allocation4]  }
  0x23   :  { %s587_s24 = smov [#allocation8]   ;;  %s511_s29 = scalar_lea.hbm %s739_s2, 512 }
  0x24   :  { %s43_s25 = sshll.u32 %s587_s24, 4  ;;  %p512_p2 = scmp.ne.s32.totalorder %s739_s2, %s511_s29  ;;  %s44_s25 = int_to_ptr.vmem [resolvable:$true] %s43_s25 }
  0x25   :  { %p515_p3 = scmp.lt.u32.totalorder %s511_s29, %s739_s2 }
  0x27   :  { %p517_p4 = pnand %p515_p3, %p512_p2 }
  0x29   :  { %520 = shalt.err (!%p517_p4)
}
  0x2a   :  { %s521_s11 = scalar_lea.vmem %s44_s25, 512  ;;  %p526_p6 = scmp.lt.s32.totalorder %s44_s25, %s44_s25 }
  0x2b   :  { %p522_p5 = scmp.ne.s32.totalorder %s44_s25, %s521_s11  ;;  %p527_p7 = scmp.lt.s32.totalorder %s521_s11, %s521_s11 }
  0x2d   :  { %p528_p8 = por %p527_p7, %p526_p6 }
  0x2f   :  { %p529_p9 = pnand %p528_p8, %p522_p5 }
  0x31   :  { %532 = shalt.err (!%p529_p9)
}
  0x32   :  { %s588_s0 = smov 128   ;;  %s589_s27 = smov 8  }
  0x33   :  { %49 = dma.hbm_to_vmem [thread:$0]  %s739_s2, 512, %s44_s25, [#allocation7], %s588_s0, %s588_s0, %s589_s27  }
  0x34   :  { %577 = dma.done.wait [#allocation4], 128  }
  0x35   :  { %578 = vsyncadd [#allocation4], 4294967168 }
  0x36   :  { %579 = dma.done.wait [#allocation7], 640  }
  0x37   :  { %580 = vsyncadd [#allocation7], 4294966656  ;;  %v590_v0 = vmov 0.0|0.0   ;;  %vm591_vm0 = vmmov 0   ;;  %v592_v1 = vmov 0.0   ;;  %v65_v2 = vld [vmem:[#allocation8] sm:$0xff]  ;;  %v72_v24 = vlaneseq }
  0x38   :  { %428 = vmatprep.subr.bf16.mxu0 %v590_v0  ;;  %434 = vmatprep.subr.bf16.mxu1 %v590_v0  ;;  %v66_v3 = vld [vmem:[#allocation8 + $0x8] sm:$0xff]  ;;  %v67_v4 = vld [vmem:[#allocation8 + $0x10] sm:$0xff]  ;;  %v68_v6 = vld [vmem:[#allocation8 + $0x18] sm:$0xff]  ;;  %vm85_vm1 = vcmask 261120   ;;  %v170_v27 = vstv %s742_s5  ;;  %v593_v32 = vmov 0   ;;  %vm275_vm4 = vcmask 57344  }
  0x39   :  { %414 = vmatprep.mubr.msk.f32.mxu0 %vm591_vm0, %v592_v1  ;;  %425 = vmatprep.mubr.msk.f32.mxu1 %vm591_vm0, %v592_v1  ;;  %v429_v5 = vpack.c.bf16 %v66_v3, %v65_v2  ;;  %v432_v7 = vpack.c.bf16 %v68_v6, %v67_v4  ;;  %v78_v8 = vld [vmem:[#allocation3] sm:$0xff]  ;;  %v172_v9 = vld [vmem:[#allocation6] sm:$0xff]  ;;  %v684_v25 = vand.u32 127, %v72_v24  ;;  %v270_v26 = vshrl.u32 %v72_v24, 7  ;;  %s594_s5 = smov [#allocation9]   ;;  %s595_s21 = smov [#allocation10]  }
  0x3a   :  { %v392_v10 = vld [vmem:[%s740_s3] ss:$0 sm:$0xff]  ;;  %s368_s18 = sshll.u32 %s594_s5, 4  ;;  %s378_s22 = sshll.u32 %s595_s21, 4  ;;  %s369_s18 = int_to_ptr.vmem [resolvable:$true] %s368_s18  ;;  %s705_s22 = int_to_ptr.vmem [resolvable:$true] %s378_s22 }
  0x3b   :  { %430 = vmatpush3.bf16.msra.mxu0 %v429_v5  ;;  %436 = vmatpush3.bf16.msra.mxu1 %v429_v5  ;;  %v394_v17 = vld [vmem:[%s741_s4] ss:$0 sm:$0xff]  ;;  %v271_v30 = vsub.s32 %v684_v25, %v270_v26  ;;  %vm77_vm3 = vcmp.lt.s32.totalorder %v684_v25, 8  ;;  %s533_s25 = scalar_lea.vmem %s369_s18, 16  ;;  %s537_s26 = scalar_lea.vmem %s369_s18, 32 }
  0x3c   :  { %431 = vmatprep.subr.bf16.mxu0 %v590_v0  ;;  %437 = vmatprep.subr.bf16.mxu1 %v590_v0  ;;  %p534_p10 = scmp.ne.s32.totalorder %s369_s18, %s533_s25  ;;  %p538_p11 = scmp.lt.s32.totalorder %s369_s18, %s369_s18 }
  0x3d   :  { %p539_p12 = scmp.lt.s32.totalorder %s537_s26, %s533_s25 }
  0x3f   :  { %433 = vmatpush3.bf16.msra.mxu0 %v432_v7  ;;  %439 = vmatpush3.bf16.msra.mxu1 %v432_v7  ;;  %p540_p13 = por %p539_p12, %p538_p11 }
  0x41   :  { %p541_p0 = pnand %p540_p13, %p534_p10 }
  0x42   :  { %415 = vmatmul.mubr.msk.f32.vlgmr.msra.gmra.mrb[0].mxu0 %vm85_vm1, %v78_v8  ;;  %426 = vmatmul.mubr.msk.f32.vlgmr.msra.gmra.mrb[0].mxu1 %vm85_vm1, %v172_v9 }
 0x115   :  { %v155_v11 = vpop.f32.mrb[0].mxu0  ;;  %v242_v12 = vpop.f32.mrb[0].mxu1 }
 0x116   :  { %v156_v13 = vadd.f32 %v392_v10, %v155_v11  ;;  %v416_v14 = vpop.f32.mrb[1].mxu0  ;;  %v243_v15 = vadd.f32 %v392_v10, %v242_v12  ;;  %v427_v16 = vpop.f32.mrb[1].mxu1 }
 0x118   :  { %v159_v18 = vmax.f32 %v156_v13, 0.0  ;;  %v246_v19 = vmax.f32 %v243_v15, 0.0 }
 0x11a   :  { %v166_v20 = vmul.f32 %v394_v17, %v159_v18  ;;  %v247_v21 = vmul.f32 %v394_v17, %v246_v19 }
 0x11c   :  { %v167_v22 = vsel %vm85_vm1, %v166_v20, 0.0  ;;  %v248_v23 = vsel %vm85_vm1, %v247_v21, 0.0 }
 0x11d   :  { %168 = vadd.xlane.f32.xlu0 %v167_v22 }
 0x121   :  { %249 = vadd.xlane.f32.xlu0 %v248_v23 }
 0x1aa   :  { %v169_v28 = vpop.xlane.xlu0 %168 }
 0x1ab   :  { %v171_v29 = vadd.f32 %v170_v27, %v169_v28 }
 0x1ad   :  { %v252_v31 = vsub.f32 0.0, %v171_v29  ;;  %vm319_vm2 = vcmp.ge.f32.partialorder %v171_v29, 0.0 }
 0x1ae   :  { %v320_v33 = vsel %vm319_vm2, 1, %v593_v32  ;;  %v250_v34 = vpop.xlane.xlu0 %249 }
 0x1af   :  { %v254_v35 = vand.u32 2147483647, %v252_v31  ;;  %v251_v36 = vadd.f32 %v250_v34, %v170_v27  ;;  %v324_v37 = vrot.slane %v320_v33, %v271_v30  ;;  %v253_v59 = vmax.f32 %v252_v31, 0.0 }
 0x1b1   :  { %v255_v38 = vsub.f32 0.0, %v254_v35  ;;  %v287_v39 = vand.u32 2147483647, %v251_v36  ;;  %vm325_vm5 = vcmp.ne.s32.totalorder %v324_v37, 0  ;;  %vm338_vm7 = vcmp.lt.f32.partialorder %v251_v36, 0.0 }
 0x1b2   :  { %vm326_vm6 = vmand %vm77_vm3, %vm325_vm5  ;;  %v339_v63 = vsel %vm338_vm7, 1, %v593_v32  ;;  %v286_v0 = vmax.f32 %v251_v36, 0.0 }
 0x1b3   :  { %v256_v40 = vmul.f32 1.442695, %v255_v38  ;;  %v288_v41 = vsub.f32 0.0, %v287_v39  ;;  %v327_v42 = vsel %vm326_vm6, 1.0, %v592_v1  ;;  %v343_v5 = vrot.slane %v339_v63, %v271_v30 }
 0x1b4   :  { %v328_v44 = vsel %vm275_vm4, %v327_v42, 0.0 }
 0x1b5   :  { %459 = vpow2.f32 %v256_v40  ;;  %v289_v43 = vmul.f32 1.442695, %v288_v41  ;;  %329 = vadd.xlane.f32.xlu0 %v328_v44  ;;  %vm344_vm10 = vcmp.ne.s32.totalorder %v343_v5, 0 }
 0x1b6   :  { %vm345_vm11 = vmand %vm77_vm3, %vm344_vm10 }
 0x1b7   :  { %461 = vpow2.f32 %v289_v43  ;;  %v346_v12 = vsel %vm345_vm11, 1.0, %v592_v1 }
 0x1b8   :  { %v347_v13 = vsel %vm275_vm4, %v346_v12, 0.0 }
 0x1bf   :  { %v460_v45 = vpop.eup %459 }
 0x1c0   :  { %v258_v46 = vadd.f32 1.0, %v460_v45  ;;  %v261_v49 = vmul.f32 -0.5, %v460_v45  ;;  %v264_v52 = vand.u32 2147483647, %v460_v45 }
 0x1c1   :  { %v462_v47 = vpop.eup %461 }
 0x1c2   :  { %v291_v48 = vadd.f32 1.0, %v462_v47  ;;  %463 = vlog2.f32 %v258_v46  ;;  %v294_v50 = vmul.f32 -0.5, %v462_v47  ;;  %v262_v51 = vadd.f32 1.0, %v261_v49 }
 0x1c3   :  { %v297_v55 = vand.u32 2147483647, %v462_v47  ;;  %vm265_vm8 = vcmp.lt.f32.partialorder %v264_v52, 0.0004427343 }
 0x1c4   :  { %465 = vlog2.f32 %v291_v48  ;;  %v295_v53 = vadd.f32 1.0, %v294_v50  ;;  %v263_v57 = vmul.f32 %v460_v45, %v262_v51 }
 0x1c5   :  { %vm298_vm9 = vcmp.lt.f32.partialorder %v297_v55, 0.0004427343 }
 0x1c6   :  { %v296_v61 = vmul.f32 %v462_v47, %v295_v53 }
 0x1cc   :  { %v464_v54 = vpop.eup %463 }
 0x1cd   :  { %v260_v56 = vmul.f32 0.6931472, %v464_v54 }
 0x1ce   :  { %v466_v58 = vpop.eup %465 }
 0x1cf   :  { %v293_v60 = vmul.f32 0.6931472, %v466_v58  ;;  %v266_v62 = vsel %vm265_vm8, %v263_v57, %v260_v56 }
 0x1d0   :  { %v267_v2 = vadd.f32 %v266_v62, %v253_v59 }
 0x1d1   :  { %v299_v3 = vsel %vm298_vm9, %v296_v61, %v293_v60 }
 0x1d2   :  { %v300_v4 = vadd.f32 %v299_v3, %v286_v0  ;;  %v272_v7 = vrot.slane %v267_v2, %v271_v30 }
 0x1d4   :  { %v305_v6 = vrot.slane %v300_v4, %v271_v30  ;;  %v274_v10 = vsel %vm77_vm3, %v272_v7, 0.0 }
 0x1d5   :  { %v276_v11 = vsel %vm275_vm4, %v274_v10, 0.0 }
 0x1d6   :  { %v307_v8 = vsel %vm77_vm3, %v305_v6, 0.0 }
 0x1d7   :  { %v308_v9 = vsel %vm275_vm4, %v307_v8, 0.0 }
 0x1d8   :  { %309 = vadd.xlane.f32.xlu1 %v308_v9 }
 0x1dc   :  { %277 = vadd.xlane.f32.xlu1 %v276_v11 }
 0x1e0   :  { %348 = vadd.xlane.f32.xlu1 %v347_v13 }
 0x242   :  { %v330_v14 = vpop.xlane.xlu0 %329 }
 0x243   :  { %v331_v15 = vrot.slane %v330_v14, 4 }
 0x245   :  { %v332_v17 = vadd.f32 %v331_v15, %v330_v14 }
 0x247   :  { %v333_v21 = vrot.slane %v332_v17, 2 }
 0x249   :  { %v334_v27 = vadd.f32 %v333_v21, %v332_v17 }
 0x24b   :  { %v335_v34 = vrot.slane %v334_v27, 1 }
 0x24d   :  { %v336_v38 = vadd.f32 %v335_v34, %v334_v27 }
 0x265   :  { %v310_v16 = vpop.xlane.xlu1 %309 }
 0x266   :  { %v311_v18 = vrot.slane %v310_v16, 4 }
 0x268   :  { %v312_v19 = vadd.f32 %v311_v18, %v310_v16 }
 0x269   :  { %v278_v20 = vpop.xlane.xlu1 %277 }
 0x26a   :  { %v313_v22 = vrot.slane %v312_v19, 2  ;;  %v279_v23 = vrot.slane %v278_v20, 4 }
 0x26c   :  { %v280_v24 = vadd.f32 %v279_v23, %v278_v20  ;;  %v314_v26 = vadd.f32 %v313_v22, %v312_v19 }
 0x26d   :  { %v349_v25 = vpop.xlane.xlu1 %348 }
 0x26e   :  { %v281_v28 = vrot.slane %v280_v24, 2  ;;  %v350_v29 = vrot.slane %v349_v25, 4  ;;  %v315_v31 = vrot.slane %v314_v26, 1 }
 0x270   :  { %v351_v1 = vadd.f32 %v350_v29, %v349_v25  ;;  %v282_v30 = vadd.f32 %v281_v28, %v280_v24  ;;  %v316_v37 = vadd.f32 %v315_v31, %v314_v26 }
 0x272   :  { %v352_v32 = vrot.slane %v351_v1, 2  ;;  %v283_v33 = vrot.slane %v282_v30, 1 }
 0x274   :  { %v353_v35 = vadd.f32 %v352_v32, %v351_v1  ;;  %v284_v36 = vadd.f32 %v283_v33, %v282_v30 }
 0x276   :  { %440 = vpush %v284_v36  ;;  %v354_v39 = vrot.slane %v353_v35, 1 }
 0x277   :  { %442 = vpush %v316_v37 }
 0x278   :  { %444 = vpush %v336_v38  ;;  %v355_v40 = vadd.f32 %v354_v39, %v353_v35 }
 0x27a   :  { %446 = vpush %v355_v40 }
 0x2a7   :  { %s441_s4 = spop %440 }
 0x2a8   :  { %s443_s19 = spop %442 }
 0x2a9   :  { %s318_s20 = sadd.f32 %s443_s19, %s441_s4  ;;  %s445_s1 = spop %444 }
 0x2ab   :  { %v358_v41 = vstv %s318_s20  ;;  %s447_s23 = spop %446 }
 0x2ac   :  { %359 = vst [vmem:[#allocation9] sm:$0x1] %v358_v41  ;;  %s357_s24 = sadd.f32 %s447_s23, %s445_s1 }
 0x2ad   :  { %544 = shalt.err (!%p541_p0)
}
 0x2ae   :  { %s545_s30 = scalar_lea.hbm %s743_s6, 16 }
 0x2af   :  { %p546_p1 = scmp.ne.s32.totalorder %s743_s6, %s545_s30  ;;  %p549_p2 = scmp.lt.u32.totalorder %s545_s30, %s743_s6 }
 0x2b1   :  { %p551_p3 = pnand %p549_p2, %p546_p1 }
 0x2b3   :  { %554 = shalt.err (!%p551_p3)
}
 0x2b4   :  { %371 = dma.vmem_to_hbm [thread:$0]  %s369_s18, 16, %s743_s6, [#allocation5]   ;;  %v360_v42 = vstv %s357_s24 }
 0x2b5   :  { %361 = vst [vmem:[#allocation10] sm:$0x1] %v360_v42  ;;  %s555_s12 = scalar_lea.vmem %s705_s22, 16  ;;  %s559_s13 = scalar_lea.vmem %s705_s22, 32 }
 0x2b6   :  { %p556_p4 = scmp.ne.s32.totalorder %s705_s22, %s555_s12  ;;  %p560_p5 = scmp.lt.s32.totalorder %s705_s22, %s705_s22 }
 0x2b7   :  { %p561_p6 = scmp.lt.s32.totalorder %s559_s13, %s555_s12 }
 0x2b9   :  { %p562_p7 = por %p561_p6, %p560_p5 }
 0x2bb   :  { %p563_p8 = pnand %p562_p7, %p556_p4 }
 0x2bd   :  { %566 = shalt.err (!%p563_p8)
}
 0x2be   :  { %s567_s15 = scalar_lea.hbm %s744_s7, 16 }
 0x2bf   :  { %p568_p9 = scmp.ne.s32.totalorder %s744_s7, %s567_s15  ;;  %p571_p10 = scmp.lt.u32.totalorder %s567_s15, %s744_s7 }
 0x2c1   :  { %p573_p11 = pnand %p571_p10, %p568_p9 }
 0x2c3   :  { %576 = shalt.err (!%p573_p11)
}
 0x2c4   :  { %381 = dma.vmem_to_hbm [thread:$0]  %s705_s22, 16, %s744_s7, [#allocation11]  }
 0x2c5   :  { %581 = dma.done.wait [#allocation5], 16  }
 0x2c6   :  { %582 = vsyncadd [#allocation5], 4294967280 }
 0x2c7   :  { %583 = dma.done.wait [#allocation11], 16  }
 0x2c8   :  { %584 = vsyncadd [#allocation11], 4294967280 }
 0x2c9   :  { %388 = vsyncpa [#allocation4], 1 }
 0x2ca   :  { %389 = vsyncpa [#allocation7], 1 }
 0x2cb   :  { %390 = vsyncpa [#allocation5], 1 }
 0x2cc   :  { %391 = vsyncpa [#allocation11], 1 }

// kernel: tpu_custom_call.1
= control target key start
LH: loop header
LB: loop body
LE: loop exit
PB: predicated region body
PF: predicated region fallthrough
CT: control target
= control target key end

     0   :  { %14 = vsyncpa [#allocation4], 0  ;;  %s737_s0 = inlined_call_operand.hbm [shape: f32[8,32], index: 0, kind: input, shape index: {}]   ;;  %s738_s1 = inlined_call_operand.hbm [shape: f32[8,32], index: 1, kind: input, shape index: {}]   ;;  %s739_s2 = inlined_call_operand.hbm [shape: f32[32,32], index: 2, kind: input, shape index: {}]   ;;  %s740_s3 = inlined_call_operand.vmem [shape: f32[1,32], index: 3, kind: input, shape index: {}]   ;;  %s741_s4 = inlined_call_operand.vmem [shape: f32[1,32], index: 4, kind: input, shape index: {}]   ;;  %s742_s5 = inlined_call_operand.<no memory space> [shape: f32[1], index: 5, kind: input, shape index: {}]   ;;  %s743_s6 = inlined_call_operand.hbm [shape: f32[1,1,128], index: 6, kind: output, shape index: {0}]   ;;  %s744_s7 = inlined_call_operand.hbm [shape: f32[1,1,128], index: 7, kind: output, shape index: {1}]  }
   0x1   :  { %15 = vsyncpa [#allocation7], 0 }
   0x2   :  { %16 = vsyncpa [#allocation5], 0 }
   0x3   :  { %17 = vsyncpa [#allocation11], 0  ;;  %s585_s24 = smov [#allocation6]   ;;  %s586_s26 = smov [#allocation3]  }
   0x4   :  { %s34_s25 = sshll.u32 %s585_s24, 4  ;;  %s24_s27 = sshll.u32 %s586_s26, 4  ;;  %s35_s25 = int_to_ptr.vmem [resolvable:$true] %s34_s25  ;;  %s25_s27 = int_to_ptr.vmem [resolvable:$true] %s24_s27 }
   0x5   :  { %s467_s30 = scalar_lea.hbm %s738_s1, 128 }
   0x6   :  { %p468_p0 = scmp.ne.s32.totalorder %s738_s1, %s467_s30  ;;  %p471_p1 = scmp.lt.u32.totalorder %s467_s30, %s738_s1 }
   0x8   :  { %p473_p2 = pnand %p471_p1, %p468_p0 }
   0xa   :  { %476 = shalt.err (!%p473_p2)
}
   0xb   :  { %s477_s12 = scalar_lea.vmem %s35_s25, 128  ;;  %p482_p4 = scmp.lt.s32.totalorder %s35_s25, %s35_s25 }
   0xc   :  { %p478_p3 = scmp.ne.s32.totalorder %s35_s25, %s477_s12  ;;  %p483_p5 = scmp.lt.s32.totalorder %s477_s12, %s477_s12 }
   0xe   :  { %p484_p6 = por %p483_p5, %p482_p4 }
  0x10   :  { %p485_p7 = pnand %p484_p6, %p478_p3 }
  0x12   :  { %488 = shalt.err (!%p485_p7)
}
  0x13   :  { %37 = dma.hbm_to_vmem [thread:$0]  %s738_s1, 128, %s35_s25, [#allocation7]  }
  0x14   :  { %s489_s17 = scalar_lea.hbm %s737_s0, 128 }
  0x15   :  { %p490_p8 = scmp.ne.s32.totalorder %s737_s0, %s489_s17  ;;  %p493_p9 = scmp.lt.u32.totalorder %s489_s17, %s737_s0 }
  0x17   :  { %p495_p10 = pnand %p493_p9, %p490_p8 }
  0x19   :  { %498 = shalt.err (!%p495_p10)
}
  0x1a   :  { %s499_s22 = scalar_lea.vmem %s25_s27, 128  ;;  %p504_p12 = scmp.lt.s32.totalorder %s25_s27, %s25_s27 }
  0x1b   :  { %p500_p11 = scmp.ne.s32.totalorder %s25_s27, %s499_s22  ;;  %p505_p13 = scmp.lt.s32.totalorder %s499_s22, %s499_s22 }
  0x1d   :  { %p506_p0 = por %p505_p13, %p504_p12 }
  0x1f   :  { %p507_p1 = pnand %p506_p0, %p500_p11 }
  0x21   :  { %510 = shalt.err (!%p507_p1)
}
  0x22   :  { %27 = dma.hbm_to_vmem [thread:$0]  %s737_s0, 128, %s25_s27, [#allocation4]  }
  0x23   :  { %s587_s24 = smov [#allocation8]   ;;  %s511_s29 = scalar_lea.hbm %s739_s2, 512 }
  0x24   :  { %s43_s25 = sshll.u32 %s587_s24, 4  ;;  %p512_p2 = scmp.ne.s32.totalorder %s739_s2, %s511_s29  ;;  %s44_s25 = int_to_ptr.vmem [resolvable:$true] %s43_s25 }
  0x25   :  { %p515_p3 = scmp.lt.u32.totalorder %s511_s29, %s739_s2 }
  0x27   :  { %p517_p4 = pnand %p515_p3, %p512_p2 }
  0x29   :  { %520 = shalt.err (!%p517_p4)
}
  0x2a   :  { %s521_s11 = scalar_lea.vmem %s44_s25, 512  ;;  %p526_p6 = scmp.lt.s32.totalorder %s44_s25, %s44_s25 }
  0x2b   :  { %p522_p5 = scmp.ne.s32.totalorder %s44_s25, %s521_s11  ;;  %p527_p7 = scmp.lt.s32.totalorder %s521_s11, %s521_s11 }
  0x2d   :  { %p528_p8 = por %p527_p7, %p526_p6 }
  0x2f   :  { %p529_p9 = pnand %p528_p8, %p522_p5 }
  0x31   :  { %532 = shalt.err (!%p529_p9)
}
  0x32   :  { %s588_s0 = smov 128   ;;  %s589_s27 = smov 8  }
  0x33   :  { %49 = dma.hbm_to_vmem [thread:$0]  %s739_s2, 512, %s44_s25, [#allocation7], %s588_s0, %s588_s0, %s589_s27  }
  0x34   :  { %577 = dma.done.wait [#allocation4], 128  }
  0x35   :  { %578 = vsyncadd [#allocation4], 4294967168 }
  0x36   :  { %579 = dma.done.wait [#allocation7], 640  }
  0x37   :  { %580 = vsyncadd [#allocation7], 4294966656  ;;  %v590_v0 = vmov 0.0|0.0   ;;  %vm591_vm0 = vmmov 0   ;;  %v592_v1 = vmov 0.0   ;;  %v65_v2 = vld [vmem:[#allocation8] sm:$0xff]  ;;  %v72_v24 = vlaneseq }
  0x38   :  { %428 = vmatprep.subr.bf16.mxu0 %v590_v0  ;;  %434 = vmatprep.subr.bf16.mxu1 %v590_v0  ;;  %v66_v3 = vld [vmem:[#allocation8 + $0x8] sm:$0xff]  ;;  %v67_v4 = vld [vmem:[#allocation8 + $0x10] sm:$0xff]  ;;  %v68_v6 = vld [vmem:[#allocation8 + $0x18] sm:$0xff]  ;;  %vm85_vm1 = vcmask 261120   ;;  %v170_v27 = vstv %s742_s5  ;;  %v593_v32 = vmov 0   ;;  %vm275_vm4 = vcmask 57344  }
  0x39   :  { %414 = vmatprep.mubr.msk.f32.mxu0 %vm591_vm0, %v592_v1  ;;  %425 = vmatprep.mubr.msk.f32.mxu1 %vm591_vm0, %v592_v1  ;;  %v429_v5 = vpack.c.bf16 %v66_v3, %v65_v2  ;;  %v432_v7 = vpack.c.bf16 %v68_v6, %v67_v4  ;;  %v78_v8 = vld [vmem:[#allocation3] sm:$0xff]  ;;  %v172_v9 = vld [vmem:[#allocation6] sm:$0xff]  ;;  %v684_v25 = vand.u32 127, %v72_v24  ;;  %v270_v26 = vshrl.u32 %v72_v24, 7  ;;  %s594_s5 = smov [#allocation9]   ;;  %s595_s21 = smov [#allocation10]  }
  0x3a   :  { %v392_v10 = vld [vmem:[%s740_s3] ss:$0 sm:$0xff]  ;;  %s368_s18 = sshll.u32 %s594_s5, 4  ;;  %s378_s22 = sshll.u32 %s595_s21, 4  ;;  %s369_s18 = int_to_ptr.vmem [resolvable:$true] %s368_s18  ;;  %s705_s22 = int_to_ptr.vmem [resolvable:$true] %s378_s22 }
  0x3b   :  { %430 = vmatpush3.bf16.msra.mxu0 %v429_v5  ;;  %436 = vmatpush3.bf16.msra.mxu1 %v429_v5  ;;  %v394_v17 = vld [vmem:[%s741_s4] ss:$0 sm:$0xff]  ;;  %v271_v30 = vsub.s32 %v684_v25, %v270_v26  ;;  %vm77_vm3 = vcmp.lt.s32.totalorder %v684_v25, 8  ;;  %s533_s25 = scalar_lea.vmem %s369_s18, 16  ;;  %s537_s26 = scalar_lea.vmem %s369_s18, 32 }
  0x3c   :  { %431 = vmatprep.subr.bf16.mxu0 %v590_v0  ;;  %437 = vmatprep.subr.bf16.mxu1 %v590_v0  ;;  %p534_p10 = scmp.ne.s32.totalorder %s369_s18, %s533_s25  ;;  %p538_p11 = scmp.lt.s32.totalorder %s369_s18, %s369_s18 }
  0x3d   :  { %p539_p12 = scmp.lt.s32.totalorder %s537_s26, %s533_s25 }
  0x3f   :  { %433 = vmatpush3.bf16.msra.mxu0 %v432_v7  ;;  %439 = vmatpush3.bf16.msra.mxu1 %v432_v7  ;;  %p540_p13 = por %p539_p12, %p538_p11 }
  0x41   :  { %p541_p0 = pnand %p540_p13, %p534_p10 }
  0x42   :  { %415 = vmatmul.mubr.msk.f32.vlgmr.msra.gmra.mrb[0].mxu0 %vm85_vm1, %v78_v8  ;;  %426 = vmatmul.mubr.msk.f32.vlgmr.msra.gmra.mrb[0].mxu1 %vm85_vm1, %v172_v9 }
 0x115   :  { %v155_v11 = vpop.f32.mrb[0].mxu0  ;;  %v242_v12 = vpop.f32.mrb[0].mxu1 }
 0x116   :  { %v156_v13 = vadd.f32 %v392_v10, %v155_v11  ;;  %v416_v14 = vpop.f32.mrb[1].mxu0  ;;  %v243_v15 = vadd.f32 %v392_v10, %v242_v12  ;;  %v427_v16 = vpop.f32.mrb[1].mxu1 }
 0x118   :  { %v159_v18 = vmax.f32 %v156_v13, 0.0  ;;  %v246_v19 = vmax.f32 %v243_v15, 0.0 }
 0x11a   :  { %v166_v20 = vmul.f32 %v394_v17, %v159_v18  ;;  %v247_v21 = vmul.f32 %v394_v17, %v246_v19 }
 0x11c   :  { %v167_v22 = vsel %vm85_vm1, %v166_v20, 0.0  ;;  %v248_v23 = vsel %vm85_vm1, %v247_v21, 0.0 }
 0x11d   :  { %168 = vadd.xlane.f32.xlu0 %v167_v22 }
 0x121   :  { %249 = vadd.xlane.f32.xlu0 %v248_v23 }
 0x1aa   :  { %v169_v28 = vpop.xlane.xlu0 %168 }
 0x1ab   :  { %v171_v29 = vadd.f32 %v170_v27, %v169_v28 }
 0x1ad   :  { %v252_v31 = vsub.f32 0.0, %v171_v29  ;;  %vm319_vm2 = vcmp.ge.f32.partialorder %v171_v29, 0.0 }
 0x1ae   :  { %v320_v33 = vsel %vm319_vm2, 1, %v593_v32  ;;  %v250_v34 = vpop.xlane.xlu0 %249 }
 0x1af   :  { %v254_v35 = vand.u32 2147483647, %v252_v31  ;;  %v251_v36 = vadd.f32 %v250_v34, %v170_v27  ;;  %v324_v37 = vrot.slane %v320_v33, %v271_v30  ;;  %v253_v59 = vmax.f32 %v252_v31, 0.0 }
 0x1b1   :  { %v255_v38 = vsub.f32 0.0, %v254_v35  ;;  %v287_v39 = vand.u32 2147483647, %v251_v36  ;;  %vm325_vm5 = vcmp.ne.s32.totalorder %v324_v37, 0  ;;  %vm338_vm7 = vcmp.lt.f32.partialorder %v251_v36, 0.0 }
 0x1b2   :  { %vm326_vm6 = vmand %vm77_vm3, %vm325_vm5  ;;  %v339_v63 = vsel %vm338_vm7, 1, %v593_v32  ;;  %v286_v0 = vmax.f32 %v251_v36, 0.0 }
 0x1b3   :  { %v256_v40 = vmul.f32 1.442695, %v255_v38  ;;  %v288_v41 = vsub.f32 0.0, %v287_v39  ;;  %v327_v42 = vsel %vm326_vm6, 1.0, %v592_v1  ;;  %v343_v5 = vrot.slane %v339_v63, %v271_v30 }
 0x1b4   :  { %v328_v44 = vsel %vm275_vm4, %v327_v42, 0.0 }
 0x1b5   :  { %459 = vpow2.f32 %v256_v40  ;;  %v289_v43 = vmul.f32 1.442695, %v288_v41  ;;  %329 = vadd.xlane.f32.xlu0 %v328_v44  ;;  %vm344_vm10 = vcmp.ne.s32.totalorder %v343_v5, 0 }
 0x1b6   :  { %vm345_vm11 = vmand %vm77_vm3, %vm344_vm10 }
 0x1b7   :  { %461 = vpow2.f32 %v289_v43  ;;  %v346_v12 = vsel %vm345_vm11, 1.0, %v592_v1 }
 0x1b8   :  { %v347_v13 = vsel %vm275_vm4, %v346_v12, 0.0 }
 0x1bf   :  { %v460_v45 = vpop.eup %459 }
 0x1c0   :  { %v258_v46 = vadd.f32 1.0, %v460_v45  ;;  %v261_v49 = vmul.f32 -0.5, %v460_v45  ;;  %v264_v52 = vand.u32 2147483647, %v460_v45 }
 0x1c1   :  { %v462_v47 = vpop.eup %461 }
 0x1c2   :  { %v291_v48 = vadd.f32 1.0, %v462_v47  ;;  %463 = vlog2.f32 %v258_v46  ;;  %v294_v50 = vmul.f32 -0.5, %v462_v47  ;;  %v262_v51 = vadd.f32 1.0, %v261_v49 }
 0x1c3   :  { %v297_v55 = vand.u32 2147483647, %v462_v47  ;;  %vm265_vm8 = vcmp.lt.f32.partialorder %v264_v52, 0.0004427343 }
 0x1c4   :  { %465 = vlog2.f32 %v291_v48  ;;  %v295_v53 = vadd.f32 1.0, %v294_v50  ;;  %v263_v57 = vmul.f32 %v460_v45, %v262_v51 }
 0x1c5   :  { %vm298_vm9 = vcmp.lt.f32.partialorder %v297_v55, 0.0004427343 }
 0x1c6   :  { %v296_v61 = vmul.f32 %v462_v47, %v295_v53 }
 0x1cc   :  { %v464_v54 = vpop.eup %463 }
 0x1cd   :  { %v260_v56 = vmul.f32 0.6931472, %v464_v54 }
 0x1ce   :  { %v466_v58 = vpop.eup %465 }
 0x1cf   :  { %v293_v60 = vmul.f32 0.6931472, %v466_v58  ;;  %v266_v62 = vsel %vm265_vm8, %v263_v57, %v260_v56 }
 0x1d0   :  { %v267_v2 = vadd.f32 %v266_v62, %v253_v59 }
 0x1d1   :  { %v299_v3 = vsel %vm298_vm9, %v296_v61, %v293_v60 }
 0x1d2   :  { %v300_v4 = vadd.f32 %v299_v3, %v286_v0  ;;  %v272_v7 = vrot.slane %v267_v2, %v271_v30 }
 0x1d4   :  { %v305_v6 = vrot.slane %v300_v4, %v271_v30  ;;  %v274_v10 = vsel %vm77_vm3, %v272_v7, 0.0 }
 0x1d5   :  { %v276_v11 = vsel %vm275_vm4, %v274_v10, 0.0 }
 0x1d6   :  { %v307_v8 = vsel %vm77_vm3, %v305_v6, 0.0 }
 0x1d7   :  { %v308_v9 = vsel %vm275_vm4, %v307_v8, 0.0 }
 0x1d8   :  { %309 = vadd.xlane.f32.xlu1 %v308_v9 }
 0x1dc   :  { %277 = vadd.xlane.f32.xlu1 %v276_v11 }
 0x1e0   :  { %348 = vadd.xlane.f32.xlu1 %v347_v13 }
 0x242   :  { %v330_v14 = vpop.xlane.xlu0 %329 }
 0x243   :  { %v331_v15 = vrot.slane %v330_v14, 4 }
 0x245   :  { %v332_v17 = vadd.f32 %v331_v15, %v330_v14 }
 0x247   :  { %v333_v21 = vrot.slane %v332_v17, 2 }
 0x249   :  { %v334_v27 = vadd.f32 %v333_v21, %v332_v17 }
 0x24b   :  { %v335_v34 = vrot.slane %v334_v27, 1 }
 0x24d   :  { %v336_v38 = vadd.f32 %v335_v34, %v334_v27 }
 0x265   :  { %v310_v16 = vpop.xlane.xlu1 %309 }
 0x266   :  { %v311_v18 = vrot.slane %v310_v16, 4 }
 0x268   :  { %v312_v19 = vadd.f32 %v311_v18, %v310_v16 }
 0x269   :  { %v278_v20 = vpop.xlane.xlu1 %277 }
 0x26a   :  { %v313_v22 = vrot.slane %v312_v19, 2  ;;  %v279_v23 = vrot.slane %v278_v20, 4 }
 0x26c   :  { %v280_v24 = vadd.f32 %v279_v23, %v278_v20  ;;  %v314_v26 = vadd.f32 %v313_v22, %v312_v19 }
 0x26d   :  { %v349_v25 = vpop.xlane.xlu1 %348 }
 0x26e   :  { %v281_v28 = vrot.slane %v280_v24, 2  ;;  %v350_v29 = vrot.slane %v349_v25, 4  ;;  %v315_v31 = vrot.slane %v314_v26, 1 }
 0x270   :  { %v351_v1 = vadd.f32 %v350_v29, %v349_v25  ;;  %v282_v30 = vadd.f32 %v281_v28, %v280_v24  ;;  %v316_v37 = vadd.f32 %v315_v31, %v314_v26 }
 0x272   :  { %v352_v32 = vrot.slane %v351_v1, 2  ;;  %v283_v33 = vrot.slane %v282_v30, 1 }
 0x274   :  { %v353_v35 = vadd.f32 %v352_v32, %v351_v1  ;;  %v284_v36 = vadd.f32 %v283_v33, %v282_v30 }
 0x276   :  { %440 = vpush %v284_v36  ;;  %v354_v39 = vrot.slane %v353_v35, 1 }
 0x277   :  { %442 = vpush %v316_v37 }
 0x278   :  { %444 = vpush %v336_v38  ;;  %v355_v40 = vadd.f32 %v354_v39, %v353_v35 }
 0x27a   :  { %446 = vpush %v355_v40 }
 0x2a7   :  { %s441_s4 = spop %440 }
 0x2a8   :  { %s443_s19 = spop %442 }
 0x2a9   :  { %s318_s20 = sadd.f32 %s443_s19, %s441_s4  ;;  %s445_s1 = spop %444 }
 0x2ab   :  { %v358_v41 = vstv %s318_s20  ;;  %s447_s23 = spop %446 }
 0x2ac   :  { %359 = vst [vmem:[#allocation9] sm:$0x1] %v358_v41  ;;  %s357_s24 = sadd.f32 %s447_s23, %s445_s1 }
 0x2ad   :  { %544 = shalt.err (!%p541_p0)
}
 0x2ae   :  { %s545_s30 = scalar_lea.hbm %s743_s6, 16 }
 0x2af   :  { %p546_p1 = scmp.ne.s32.totalorder %s743_s6, %s545_s30  ;;  %p549_p2 = scmp.lt.u32.totalorder %s545_s30, %s743_s6 }
 0x2b1   :  { %p551_p3 = pnand %p549_p2, %p546_p1 }
 0x2b3   :  { %554 = shalt.err (!%p551_p3)
}
 0x2b4   :  { %371 = dma.vmem_to_hbm [thread:$0]  %s369_s18, 16, %s743_s6, [#allocation5]   ;;  %v360_v42 = vstv %s357_s24 }
 0x2b5   :  { %361 = vst [vmem:[#allocation10] sm:$0x1] %v360_v42  ;;  %s555_s12 = scalar_lea.vmem %s705_s22, 16  ;;  %s559_s13 = scalar_lea.vmem %s705_s22, 32 }
 0x2b6   :  { %p556_p4 = scmp.ne.s32.totalorder %s705_s22, %s555_s12  ;;  %p560_p5 = scmp.lt.s32.totalorder %s705_s22, %s705_s22 }
 0x2b7   :  { %p561_p6 = scmp.lt.s32.totalorder %s559_s13, %s555_s12 }
 0x2b9   :  { %p562_p7 = por %p561_p6, %p560_p5 }
 0x2bb   :  { %p563_p8 = pnand %p562_p7, %p556_p4 }
 0x2bd   :  { %566 = shalt.err (!%p563_p8)
}
 0x2be   :  { %s567_s15 = scalar_lea.hbm %s744_s7, 16 }
 0x2bf   :  { %p568_p9 = scmp.ne.s32.totalorder %s744_s7, %s567_s15  ;;  %p571_p10 = scmp.lt.u32.totalorder %s567_s15, %s744_s7 }
 0x2c1   :  { %p573_p11 = pnand %p571_p10, %p568_p9 }
 0x2c3   :  { %576 = shalt.err (!%p573_p11)
}
 0x2c4   :  { %381 = dma.vmem_to_hbm [thread:$0]  %s705_s22, 16, %s744_s7, [#allocation11]  }
 0x2c5   :  { %581 = dma.done.wait [#allocation5], 16  }
 0x2c6   :  { %582 = vsyncadd [#allocation5], 4294967280 }
 0x2c7   :  { %583 = dma.done.wait [#allocation11], 16  }
 0x2c8   :  { %584 = vsyncadd [#allocation11], 4294967280 }
 0x2c9   :  { %388 = vsyncpa [#allocation4], 1 }
 0x2ca   :  { %389 = vsyncpa [#allocation7], 1 }
 0x2cb   :  { %390 = vsyncpa [#allocation5], 1 }
 0x2cc   :  { %391 = vsyncpa [#allocation11], 1 }

</bundles_post_ra>
